<compile_context>
chip_gen: v5e
topology: v5e:2x2
jax: 0.10.0
libtpu: 0.0.40
codegen_flags: <defaults>
</compile_context>

<pallas_src>
import functools

import jax
import jax.numpy as jnp
import numpy as np
from jax.experimental import pallas as pl
from jax.experimental.pallas import tpu as pltpu


def _cdiv(a, b):
    return -(-a // b)


def _round_up(x, m):
    return _cdiv(x, m) * m


def _vmem_limit_bytes():
    """Generation-aware scoped-VMEM limit (v5e/v6e: 128 MiB physical, v7x: 64 MiB)."""
    try:
        cap = int(pltpu.get_tpu_info().vmem_capacity_bytes)
    except Exception:
        cap = 64 * 1024 * 1024          # assume the small (v7x-like) size if the query fails
    return max(32 * 1024 * 1024, min((cap * 3) // 4, 96 * 1024 * 1024))


def _pick_tile_l(cin, cme, length, hb, dtype_bytes, budget_bytes):
    """Largest multiple-of-`hb` L-tile (<= array length, <= 2048) within the VMEM budget."""
    max_t = max(hb, (length // hb) * hb)        # keep blocks inside the array
    tile = min(2048, max_t)
    tile -= tile % hb
    tile = max(tile, hb)

    def est(t):
        # double-buffered in/out blocks + f32 in-kernel temporaries (ctx, window, acc, ...)
        return 2 * dtype_bytes * (cin * t + 2 * cin * hb + cme * t) + 16 * cme * t

    while tile > hb and est(tile) > budget_bytes:
        tile = max(hb, ((tile // 2) // hb) * hb)
    return tile


def _dwconv1d_kernel(xa_ref, xb_ref, xc_ref, w_ref, o_ref, *,
                     K, dilation, M, L, pad_left, pad_right):
    # xa_ref: (1, Cin, T)   current L-tile of the (un-padded) input
    # xb_ref: (1, Cin, HB)  head of the next L-tile   (right halo, index clamped at the end)
    # xc_ref: (1, Cin, HB)  tail of the previous tile (left halo, index clamped at the start)
    # w_ref : (CM, K)       per-output-channel taps (channels on sublanes, K on lanes)
    # o_ref : (1, CM, T)    CM = Cin * M
    T = o_ref.shape[2]
    HB = xb_ref.shape[2]
    t = pl.program_id(1)
    base = t * T

    w = w_ref[...].astype(jnp.float32)

    def masked(x, start_col):
        # Zero out-of-range columns (PyTorch 'same' zero padding + garbage in partial /
        # clamped boundary blocks), replicate channels for depth_multiplier, upcast to f32.
        col = jax.lax.broadcasted_iota(jnp.int32, x.shape, 1) + start_col
        x = jnp.where((col >= 0) & (col < L), x, jnp.zeros_like(x))
        if M > 1:   # output channel o = c*M + m reads input channel c (VMEM-side broadcast)
            x = jnp.concatenate(
                [jnp.broadcast_to(x[c:c + 1], (M, x.shape[1]))
                 for c in range(x.shape[0])], axis=0)
        return x.astype(jnp.float32)

    xa = masked(xa_ref[0], base)                                            # (CM, T)
    parts = [xa]
    if pad_left > 0:
        parts.insert(0, masked(xc_ref[0, :, HB - pad_left:], base - pad_left))
    if pad_right > 0:
        parts.append(masked(xb_ref[0, :, :pad_right], base + T))
    # Context is only `halo` columns wider than the output tile.
    ctx = parts[0] if len(parts) == 1 else jnp.concatenate(parts, axis=1)   # (CM, T + halo)

    # K is small & static: fully unrolled VPU MACs, accumulator seeded with tap 0.
    # TODO(synk): for very large K (>8) switch to a chunked lax.fori_loop to bound live ranges.
    acc = None
    for k in range(K):
        win = ctx[:, k * dilation:k * dilation + T]
        term = w[:, k:k + 1] * win
        acc = term if acc is None else acc + term
    o_ref[0] = acc.astype(o_ref.dtype)


def depthwise_conv1d_pallas(x, weight, *, dilation=1, depth_multiplier=1):
    """Depthwise Conv1d, stride=1, padding='same', bias-free.

    x:      (N, C, L)                       float32 or bfloat16
    weight: (C * depth_multiplier, 1, K)    PyTorch grouped-conv layout (groups = C)
    returns (N, C * depth_multiplier, L)    in x.dtype
    """
    N, C, L = x.shape
    CM, one, K = weight.shape
    M = depth_multiplier
    assert one == 1 and CM == C * M, "weight must be (C*depth_multiplier, 1, K)"

    halo = dilation * (K - 1)
    pad_left = halo // 2                    # PyTorch 'same': left = total//2, extra on right
    pad_right = halo - pad_left
    HB = _round_up(max(halo, 1), 128)       # halo-fetch width (lane aligned, >= halo)

    L_orig = L
    if L < HB:
        # Tiny sequences only: pad up to one halo block so no block exceeds the array.
        x = jnp.pad(x, ((0, 0), (0, 0), (0, HB - L)))
        L = HB

    # depth_multiplier: replicate channels on the VMEM tile inside the kernel (no HBM copy).
    if M > 1 and C > 64:
        # TODO(synk): replace this wide-channel fallback with an O(1) in-kernel replication.
        x = jnp.repeat(x, M, axis=1)
        Cin, kM = C * M, 1
    else:
        Cin, kM = C, M

    # Fold batch onto the channel/sublane axis when C*M underfills the 8 sublanes.
    fold = 1
    if C * M < 8 and N > 1:
        for f in range(min(N, max(1, 8 // (C * M))), 0, -1):
            if N % f == 0:
                fold = f
                break
    if fold > 1:
        x = x.reshape(N // fold, fold * Cin, L)

    N_eff, Cin_eff = x.shape[0], x.shape[1]
    CMe = Cin_eff * kM

    w2 = weight[:, 0, :]                    # (CM, K): lane-dense 2-D weight tile
    if fold > 1:
        w2 = jnp.tile(w2, (fold, 1))        # (CMe, K)

    vmem_limit = _vmem_limit_bytes()
    TILE_L = _pick_tile_l(Cin_eff, CMe, L, HB, x.dtype.itemsize, vmem_limit // 2)
    nt = _cdiv(L, TILE_L)
    if N_eff * nt == 1 and TILE_L > HB:     # give v7x's second TensorCore something to do
        TILE_L = max(HB, ((TILE_L // 2) // HB) * HB)
        nt = _cdiv(L, TILE_L)
    step = TILE_L // HB                     # HB divides TILE_L by construction
    last_hb = _cdiv(L, HB) - 1

    kernel = functools.partial(
        _dwconv1d_kernel, K=K, dilation=dilation, M=kM, L=L,
        pad_left=pad_left, pad_right=pad_right)

    out = pl.pallas_call(
        kernel,
        out_shape=jax.ShapeDtypeStruct((N_eff, CMe, L), x.dtype),
        grid=(N_eff, nt),
        in_specs=[
            pl.BlockSpec((1, Cin_eff, TILE_L), lambda n, t: (n, 0, t)),
            pl.BlockSpec((1, Cin_eff, HB),
                         lambda n, t: (n, 0, jnp.minimum((t + 1) * step, last_hb))),
            pl.BlockSpec((1, Cin_eff, HB),
                         lambda n, t: (n, 0, jnp.maximum(t * step - 1, 0))),
            pl.BlockSpec((CMe, K), lambda n, t: (0, 0)),
        ],
        out_specs=pl.BlockSpec((1, CMe, TILE_L), lambda n, t: (n, 0, t)),
        compiler_params=pltpu.CompilerParams(
            dimension_semantics=("parallel", "parallel"),
            vmem_limit_bytes=vmem_limit),
    )(x, x, x, w2)

    if fold > 1:
        out = out.reshape(N, CM, L)
    if L != L_orig:
        out = out[:, :, :L_orig]
    return out


class DepthwiseConv1DPallas:
    """Pallas-TPU forward of the reference PyTorch DepthwiseConv1D module."""

    def __init__(self, dim_in, kernel_size, dilation_rate, depth_multiplier,
                 padding='same', use_bias=False, key=None):
        if padding != 'same':
            raise NotImplementedError("only padding='same' (the module default) is implemented")
        if use_bias:
            # TODO(synk): bias add not implemented (module default is use_bias=False).
            raise NotImplementedError("use_bias=True is not implemented")
        self.kernel_size = kernel_size
        self.dilation = dilation_rate
        self.depth_multiplier = depth_multiplier
        key = jax.random.PRNGKey(42) if key is None else key
        # PyTorch Conv1d default init: U(-1/sqrt(fan_in), 1/sqrt(fan_in)),
        # fan_in = (in_channels / groups) * K = K for a depthwise conv.
        bound = 1.0 / float(np.sqrt(kernel_size))
        self.weight = jax.random.uniform(
            key, (dim_in * depth_multiplier, 1, kernel_size),
            minval=-bound, maxval=bound, dtype=jnp.float32)

    def __call__(self, x):
        return depthwise_conv1d_pallas(
            x, self.weight, dilation=self.dilation,
            depth_multiplier=self.depth_multiplier)


# ----------------------------------------------------------------------------
# Plain-JAX reference (grouped conv) for verification
# ----------------------------------------------------------------------------
def _reference(x, w, *, dilation):
    C = x.shape[1]
    K = w.shape[-1]
    halo = dilation * (K - 1)
    pad_l = halo // 2
    pad_r = halo - pad_l
    return jax.lax.conv_general_dilated(
        x, w, window_strides=(1,), padding=[(pad_l, pad_r)],
        rhs_dilation=(dilation,), dimension_numbers=("NCH", "OIH", "NCH"),
        feature_group_count=C)


if __name__ == "__main__":
    key = jax.random.PRNGKey(0)
    k1, k2, k3, k4, k5, k6 = jax.random.split(key, 6)

    # Config 1: batch=2, dim_in=4, L=16, kernel_size=3, dilation=2, depth_multiplier=2
    x1 = jax.random.normal(k1, (2, 4, 16), dtype=jnp.float32)
    mod1 = DepthwiseConv1DPallas(4, 3, 2, 2, key=k2)
    out1 = jax.block_until_ready(mod1(x1))
    ref1 = _reference(x1, mod1.weight, dilation=2)
    np.testing.assert_allclose(np.asarray(out1), np.asarray(ref1), rtol=1e-5, atol=1e-5)

    # Config 2: depth_multiplier=1, wider kernel, length not a multiple of 128
    x2 = jax.random.normal(k3, (2, 8, 40), dtype=jnp.float32)
    mod2 = DepthwiseConv1DPallas(8, 5, 1, 1, key=k4)
    out2 = jax.block_until_ready(mod2(x2))
    ref2 = _reference(x2, mod2.weight, dilation=1)
    np.testing.assert_allclose(np.asarray(out2), np.asarray(ref2), rtol=1e-5, atol=1e-5)

    # Config 3: multi-tile path (cross-tile halos, clamped halo fetches, 2-step grid)
    x3 = jax.random.normal(k5, (1, 8, 512), dtype=jnp.float32)
    mod3 = DepthwiseConv1DPallas(8, 3, 4, 1, key=k6)
    out3 = jax.block_until_ready(mod3(x3))
    ref3 = _reference(x3, mod3.weight, dilation=4)
    np.testing.assert_allclose(np.asarray(out3), np.asarray(ref3), rtol=1e-5, atol=1e-5)

    print("KERNEL_OK")
</pallas_src>

<mosaic_0001>
module attributes {stable_mosaic.version = 11 : i64} {
  func.func @_dwconv1d_kernel(%arg0: i32, %arg1: i32, %arg2: memref<1x4x128xf32, #tpu.memory_space<vmem>>, %arg3: memref<1x4x128xf32, #tpu.memory_space<vmem>>, %arg4: memref<1x4x128xf32, #tpu.memory_space<vmem>>, %arg5: memref<8x3xf32, #tpu.memory_space<vmem>>, %arg6: memref<1x8x128xf32, #tpu.memory_space<vmem>>) attributes {dimension_semantics = [#tpu.dimension_semantics<parallel>, #tpu.dimension_semantics<parallel>], iteration_bounds = array<i64: 2, 1>, scalar_prefetch = 0 : i64, scratch_operands = 0 : i64, tpu.core_type = #tpu.core_type<tc>, window_params = [{transform_indices = @transform_0, window_bounds = array<i64: 1, 4, 128>}, {transform_indices = @transform_1, window_bounds = array<i64: 1, 4, 128>}, {transform_indices = @transform_2, window_bounds = array<i64: 1, 4, 128>}, {pipeline_mode = #tpu.pipeline_mode<synchronous>, transform_indices = @transform_3, window_bounds = array<i64: 8, 3>}, {transform_indices = @transform_4, window_bounds = array<i64: 1, 8, 128>}]} {
    %c128_i32 = arith.constant 128 : i32
    %0 = arith.muli %arg1, %c128_i32 : i32
    %c0 = arith.constant 0 : index
    %c0_0 = arith.constant 0 : index
    %1 = vector.load %arg5[%c0, %c0_0] : memref<8x3xf32, #tpu.memory_space<vmem>>, vector<8x3xf32>
    %c0_1 = arith.constant 0 : index
    %c0_2 = arith.constant 0 : index
    %c0_3 = arith.constant 0 : index
    %2 = vector.load %arg2[%c0_1, %c0_2, %c0_3] : memref<1x4x128xf32, #tpu.memory_space<vmem>>, vector<1x4x128xf32>
    %3 = vector.shape_cast %2 : vector<1x4x128xf32> to vector<4x128xf32>
    %4 = tpu.iota {dimensions = array<i32: 1>} : vector<4x128xi32>
    %5 = vector.broadcast %0 : i32 to vector<4x128xi32>
    %6 = arith.addi %4, %5 : vector<4x128xi32>
    %c0_i32 = arith.constant 0 : i32
    %7 = vector.broadcast %c0_i32 : i32 to vector<4x128xi32>
    %8 = arith.cmpi sge, %6, %7 : vector<4x128xi32>
    %c128_i32_4 = arith.constant 128 : i32
    %9 = vector.broadcast %c128_i32_4 : i32 to vector<4x128xi32>
    %10 = arith.cmpi slt, %6, %9 : vector<4x128xi32>
    %11 = arith.andi %8, %10 : vector<4x128xi1>
    %cst = arith.constant 0.000000e+00 : f32
    %12 = vector.broadcast %cst : f32 to vector<4x128xf32>
    %13 = arith.select %11, %3, %12 : vector<4x128xi1>, vector<4x128xf32>
    %14 = vector.extract_strided_slice %13 {offsets = [0, 0], sizes = [1, 128], strides = [1, 1]} : vector<4x128xf32> to vector<1x128xf32>
    %15 = vector.shape_cast %14 : vector<1x128xf32> to vector<1x128xf32>
    %16 = vector.broadcast %15 : vector<1x128xf32> to vector<2x128xf32>
    %17 = vector.extract_strided_slice %13 {offsets = [1, 0], sizes = [1, 128], strides = [1, 1]} : vector<4x128xf32> to vector<1x128xf32>
    %18 = vector.shape_cast %17 : vector<1x128xf32> to vector<1x128xf32>
    %19 = vector.broadcast %18 : vector<1x128xf32> to vector<2x128xf32>
    %20 = vector.extract_strided_slice %13 {offsets = [2, 0], sizes = [1, 128], strides = [1, 1]} : vector<4x128xf32> to vector<1x128xf32>
    %21 = vector.shape_cast %20 : vector<1x128xf32> to vector<1x128xf32>
    %22 = vector.broadcast %21 : vector<1x128xf32> to vector<2x128xf32>
    %23 = vector.extract_strided_slice %13 {offsets = [3, 0], sizes = [1, 128], strides = [1, 1]} : vector<4x128xf32> to vector<1x128xf32>
    %24 = vector.shape_cast %23 : vector<1x128xf32> to vector<1x128xf32>
    %25 = vector.broadcast %24 : vector<1x128xf32> to vector<2x128xf32>
    %26 = tpu.concatenate %16, %19, %22, %25 in 0 : vector<2x128xf32>, vector<2x128xf32>, vector<2x128xf32>, vector<2x128xf32> -> vector<8x128xf32>
    %c0_5 = arith.constant 0 : index
    %c0_6 = arith.constant 0 : index
    %c126 = arith.constant 126 : index
    %27 = vector.load %arg4[%c0_5, %c0_6, %c126] : memref<1x4x128xf32, #tpu.memory_space<vmem>>, vector<1x4x2xf32>
    %28 = vector.shape_cast %27 : vector<1x4x2xf32> to vector<4x2xf32>
    %c2_i32 = arith.constant 2 : i32
    %29 = arith.subi %0, %c2_i32 : i32
    %30 = tpu.iota {dimensions = array<i32: 1>} : vector<4x2xi32>
    %31 = vector.broadcast %29 : i32 to vector<4x2xi32>
    %32 = arith.addi %30, %31 : vector<4x2xi32>
    %c0_i32_7 = arith.constant 0 : i32
    %33 = vector.broadcast %c0_i32_7 : i32 to vector<4x2xi32>
    %34 = arith.cmpi sge, %32, %33 : vector<4x2xi32>
    %c128_i32_8 = arith.constant 128 : i32
    %35 = vector.broadcast %c128_i32_8 : i32 to vector<4x2xi32>
    %36 = arith.cmpi slt, %32, %35 : vector<4x2xi32>
    %37 = arith.andi %34, %36 : vector<4x2xi1>
    %cst_9 = arith.constant 0.000000e+00 : f32
    %38 = vector.broadcast %cst_9 : f32 to vector<4x2xf32>
    %39 = arith.select %37, %28, %38 : vector<4x2xi1>, vector<4x2xf32>
    %40 = vector.extract_strided_slice %39 {offsets = [0, 0], sizes = [1, 2], strides = [1, 1]} : vector<4x2xf32> to vector<1x2xf32>
    %41 = vector.shape_cast %40 : vector<1x2xf32> to vector<1x2xf32>
    %42 = vector.broadcast %41 : vector<1x2xf32> to vector<2x2xf32>
    %43 = vector.extract_strided_slice %39 {offsets = [1, 0], sizes = [1, 2], strides = [1, 1]} : vector<4x2xf32> to vector<1x2xf32>
    %44 = vector.shape_cast %43 : vector<1x2xf32> to vector<1x2xf32>
    %45 = vector.broadcast %44 : vector<1x2xf32> to vector<2x2xf32>
    %46 = vector.extract_strided_slice %39 {offsets = [2, 0], sizes = [1, 2], strides = [1, 1]} : vector<4x2xf32> to vector<1x2xf32>
    %47 = vector.shape_cast %46 : vector<1x2xf32> to vector<1x2xf32>
    %48 = vector.broadcast %47 : vector<1x2xf32> to vector<2x2xf32>
    %49 = vector.extract_strided_slice %39 {offsets = [3, 0], sizes = [1, 2], strides = [1, 1]} : vector<4x2xf32> to vector<1x2xf32>
    %50 = vector.shape_cast %49 : vector<1x2xf32> to vector<1x2xf32>
    %51 = vector.broadcast %50 : vector<1x2xf32> to vector<2x2xf32>
    %52 = tpu.concatenate %42, %45, %48, %51 in 0 : vector<2x2xf32>, vector<2x2xf32>, vector<2x2xf32>, vector<2x2xf32> -> vector<8x2xf32>
    %c0_10 = arith.constant 0 : index
    %c0_11 = arith.constant 0 : index
    %c0_12 = arith.constant 0 : index
    %53 = vector.load %arg3[%c0_10, %c0_11, %c0_12] : memref<1x4x128xf32, #tpu.memory_space<vmem>>, vector<1x4x2xf32>
    %54 = vector.shape_cast %53 : vector<1x4x2xf32> to vector<4x2xf32>
    %c128_i32_13 = arith.constant 128 : i32
    %55 = arith.addi %0, %c128_i32_13 : i32
    %56 = tpu.iota {dimensions = array<i32: 1>} : vector<4x2xi32>
    %57 = vector.broadcast %55 : i32 to vector<4x2xi32>
    %58 = arith.addi %56, %57 : vector<4x2xi32>
    %c0_i32_14 = arith.constant 0 : i32
    %59 = vector.broadcast %c0_i32_14 : i32 to vector<4x2xi32>
    %60 = arith.cmpi sge, %58, %59 : vector<4x2xi32>
    %c128_i32_15 = arith.constant 128 : i32
    %61 = vector.broadcast %c128_i32_15 : i32 to vector<4x2xi32>
    %62 = arith.cmpi slt, %58, %61 : vector<4x2xi32>
    %63 = arith.andi %60, %62 : vector<4x2xi1>
    %cst_16 = arith.constant 0.000000e+00 : f32
    %64 = vector.broadcast %cst_16 : f32 to vector<4x2xf32>
    %65 = arith.select %63, %54, %64 : vector<4x2xi1>, vector<4x2xf32>
    %66 = vector.extract_strided_slice %65 {offsets = [0, 0], sizes = [1, 2], strides = [1, 1]} : vector<4x2xf32> to vector<1x2xf32>
    %67 = vector.shape_cast %66 : vector<1x2xf32> to vector<1x2xf32>
    %68 = vector.broadcast %67 : vector<1x2xf32> to vector<2x2xf32>
    %69 = vector.extract_strided_slice %65 {offsets = [1, 0], sizes = [1, 2], strides = [1, 1]} : vector<4x2xf32> to vector<1x2xf32>
    %70 = vector.shape_cast %69 : vector<1x2xf32> to vector<1x2xf32>
    %71 = vector.broadcast %70 : vector<1x2xf32> to vector<2x2xf32>
    %72 = vector.extract_strided_slice %65 {offsets = [2, 0], sizes = [1, 2], strides = [1, 1]} : vector<4x2xf32> to vector<1x2xf32>
    %73 = vector.shape_cast %72 : vector<1x2xf32> to vector<1x2xf32>
    %74 = vector.broadcast %73 : vector<1x2xf32> to vector<2x2xf32>
    %75 = vector.extract_strided_slice %65 {offsets = [3, 0], sizes = [1, 2], strides = [1, 1]} : vector<4x2xf32> to vector<1x2xf32>
    %76 = vector.shape_cast %75 : vector<1x2xf32> to vector<1x2xf32>
    %77 = vector.broadcast %76 : vector<1x2xf32> to vector<2x2xf32>
    %78 = tpu.concatenate %68, %71, %74, %77 in 0 : vector<2x2xf32>, vector<2x2xf32>, vector<2x2xf32>, vector<2x2xf32> -> vector<8x2xf32>
    %79 = tpu.concatenate %52, %26, %78 in 1 : vector<8x2xf32>, vector<8x128xf32>, vector<8x2xf32> -> vector<8x132xf32>
    %80 = vector.extract_strided_slice %79 {offsets = [0, 0], sizes = [8, 128], strides = [1, 1]} : vector<8x132xf32> to vector<8x128xf32>
    %81 = vector.extract_strided_slice %1 {offsets = [0, 0], sizes = [8, 1], strides = [1, 1]} : vector<8x3xf32> to vector<8x1xf32>
    %82 = vector.broadcast %81 : vector<8x1xf32> to vector<8x128xf32>
    %83 = arith.mulf %82, %80 : vector<8x128xf32>
    %84 = vector.extract_strided_slice %79 {offsets = [0, 2], sizes = [8, 128], strides = [1, 1]} : vector<8x132xf32> to vector<8x128xf32>
    %85 = vector.extract_strided_slice %1 {offsets = [0, 1], sizes = [8, 1], strides = [1, 1]} : vector<8x3xf32> to vector<8x1xf32>
    %86 = vector.broadcast %85 : vector<8x1xf32> to vector<8x128xf32>
    %87 = arith.mulf %86, %84 : vector<8x128xf32>
    %88 = arith.addf %83, %87 : vector<8x128xf32>
    %89 = vector.extract_strided_slice %79 {offsets = [0, 4], sizes = [8, 128], strides = [1, 1]} : vector<8x132xf32> to vector<8x128xf32>
    %90 = vector.extract_strided_slice %1 {offsets = [0, 2], sizes = [8, 1], strides = [1, 1]} : vector<8x3xf32> to vector<8x1xf32>
    %91 = vector.broadcast %90 : vector<8x1xf32> to vector<8x128xf32>
    %92 = arith.mulf %91, %89 : vector<8x128xf32>
    %93 = arith.addf %88, %92 : vector<8x128xf32>
    %c0_17 = arith.constant 0 : index
    %c0_18 = arith.constant 0 : index
    %c0_19 = arith.constant 0 : index
    %94 = vector.load %arg6[%c0_17, %c0_18, %c0_19] : memref<1x8x128xf32, #tpu.memory_space<vmem>>, vector<1x8x128xf32>
    %95 = vector.shape_cast %94 : vector<1x8x128xf32> to vector<8x128xf32>
    %96 = vector.shape_cast %93 : vector<8x128xf32> to vector<1x8x128xf32>
    tpu.vector_store %arg6[%c0_17, %c0_18, %c0_19], %96 {strides = array<i32>} : memref<1x8x128xf32, #tpu.memory_space<vmem>>, vector<1x8x128xf32>,
    return
  }
  func.func @transform_0(%arg0: i32, %arg1: i32) -> (i32, i32, i32) {
    %c0_i32 = arith.constant 0 : i32
    %c0_i32_0 = arith.constant 0 : i32
    return %arg0, %c0_i32, %arg1 : i32, i32, i32
  }
  func.func @transform_1(%arg0: i32, %arg1: i32) -> (i32, i32, i32) {
    %c1_i32 = arith.constant 1 : i32
    %0 = arith.addi %arg1, %c1_i32 : i32
    %c1_i32_0 = arith.constant 1 : i32
    %1 = arith.muli %0, %c1_i32_0 : i32
    %c0_i32 = arith.constant 0 : i32
    %2 = arith.minsi %1, %c0_i32 : i32
    %c0_i32_1 = arith.constant 0 : i32
    %c0_i32_2 = arith.constant 0 : i32
    return %arg0, %c0_i32_1, %2 : i32, i32, i32
  }
  func.func @transform_2(%arg0: i32, %arg1: i32) -> (i32, i32, i32) {
    %c1_i32 = arith.constant 1 : i32
    %0 = arith.muli %arg1, %c1_i32 : i32
    %c1_i32_0 = arith.constant 1 : i32
    %1 = arith.subi %0, %c1_i32_0 : i32
    %c0_i32 = arith.constant 0 : i32
    %2 = arith.maxsi %1, %c0_i32 : i32
    %c0_i32_1 = arith.constant 0 : i32
    %c0_i32_2 = arith.constant 0 : i32
    return %arg0, %c0_i32_1, %2 : i32, i32, i32
  }
  func.func @transform_3(%arg0: i32, %arg1: i32) -> (i32, i32) {
    %c0_i32 = arith.constant 0 : i32
    %c0_i32_0 = arith.constant 0 : i32
    %c0_i32_1 = arith.constant 0 : i32
    return %c0_i32, %c0_i32_0 : i32, i32
  }
  func.func @transform_4(%arg0: i32, %arg1: i32) -> (i32, i32, i32) {
    %c0_i32 = arith.constant 0 : i32
    %c0_i32_0 = arith.constant 0 : i32
    return %arg0, %c0_i32, %arg1 : i32, i32, i32
  }
}

</mosaic_0001>

<bundles_post_ra>
// kernel: tpu_custom_call.1
= control target key start
LH: loop header
LB: loop body
LE: loop exit
PB: predicated region body
PF: predicated region fallthrough
CT: control target
= control target key end

     0   :  { %9 = vsyncpa [#allocation3], 0  ;;  %s988_s0 = inlined_call_operand.vmem [shape: f32[2,4,128], index: 0, kind: input, shape index: {}]   ;;  %s989_s1 = inlined_call_operand.hbm [shape: f32[2,4,128], index: 1, kind: input, shape index: {}]   ;;  %s990_s2 = inlined_call_operand.hbm [shape: f32[2,4,128], index: 2, kind: input, shape index: {}]   ;;  %s991_s3 = inlined_call_operand.vmem [shape: f32[8,3], index: 3, kind: input, shape index: {}]   ;;  %s992_s4 = inlined_call_operand.hbm [shape: f32[2,8,128], index: 4, kind: output, shape index: {}]  }
   0x1   :  { %11 = vsyncpa [#allocation3 + $0x1], 0 }
   0x2   :  { %12 = vsyncpa [#allocation6], 0 }
   0x3   :  { %14 = vsyncpa [#allocation6 + $0x1], 0 }
   0x4   :  { %15 = vsyncpa [#allocation4], 0 }
   0x5   :  { %17 = vsyncpa [#allocation4 + $0x1], 0  ;;  %s842_s15 = smov 0   ;;  %s844_s16 = smov 0  }
   0x6   :  { %s846_s17 = smov 0   ;;  %s848_s18 = smov 0  }
   0x7   :  { %s850_s19 = smov 0   ;;  %s852_s20 = smov 0  }
   0x8 LB: > { %s567_s21 = sadd.s32 4294967295, %s808_s20   ;;  %s568_s22 = sadd.s32 4294967294, %s808_s20   ;;  %s808_s20 = sphi %s852_s20, %s23_s20   ;;  %s804_s19 = sphi %s850_s19, %s1004_s19   ;;  %s800_s18 = sphi %s848_s18, %s1003_s18   ;;  %s796_s17 = sphi %s846_s17, %s1002_s17   ;;  %s792_s16 = sphi %s844_s16, %s1001_s16   ;;  %s788_s15 = sphi %s842_s15, %s1000_s15  }
   0x9   : > { %s35_s23 = sadd.s32 1, %s804_s19  ;;  %s78_s24 = sadd.s32 1, %s796_s17 }
   0xa   : > { %p37_p0 = scmp.ge.s32.totalorder %s35_s23, 2  ;;  %p85_p1 = scmp.ne.s32.totalorder %s796_s17, %s792_s16 }
   0xb   : > { %p86_p2 = scmp.eq.s32.totalorder %s808_s20, 0  ;;  %p91_p3 = scmp.ne.s32.totalorder %s792_s16, %s788_s15 }
   0xc   : > { %s1006_s23 = smov (%p37_p0, %s35_s23), 0  ;;  %p92_p5 = scmp.eq.s32.totalorder %s567_s21, 0 }
   0xd   : > { %994 = sst [smem:[#allocation11_spill]] %s1006_s23  ;;  %p883_p4 = por %p86_p2, %p85_p1 }
   0xe   : > { %s73_s26 = ssub.s32 %s804_s19, %s1006_s23  ;;  %p172_p6 = scmp.eq.s32.totalorder %s567_s21, 1 }
   0xf   : > { %p76_p7 = scmp.eq.s32.totalorder %s73_s26, 0  ;;  %p889_p8 = por %p92_p5, %p91_p3 }
  0x10   : > { %p893_p9 = por %p172_p6, %p85_p1  ;;  %p178_p10 = scmp.eq.s32.totalorder %s568_s22, 1 }
  0x11   : > { %s898_s29 = scalar_select %p76_p7, %s796_s17, %s78_s24  }
  0x12   : > { %p900_p11 = por %p178_p10, %p91_p3  ;;  %p570_p12 = scmp.ge.s32.totalorder %s808_s20, 2 }
  0x13   : > { %p601_p13 = scmp.lt.s32.totalorder %s808_s20, 2  ;;  %s211_s5 = sand.u32 1, %s796_s17  }
  0x14   : > { %s571_s6 = sshll.u32 %s211_s5, 2  ;;  %s572_s7 = sshll.u32 %s804_s19, 2 }
  0x15   : > { %s223_s10 = scalar_lea.hbm %s989_s1, %s572_s7  ;;  %s215_s11 = scalar_lea.vmem [#allocation2], %s571_s6 }
  0x16   : > { %s227_s12 = sshll.u32 %s215_s11, 4  ;;  %s225_s13 = sshll.u32 %s223_s10, 4  ;;  %s228_s12 = int_to_ptr.vmem [resolvable:$true] %s227_s12  ;;  %s226_s13 = int_to_ptr.hbm [resolvable:$true] %s225_s13 }
  0x17   : > { %p591_p0 = pnand %p601_p13, %p883_p4  ;;  %p575_p1 = scmp.ge.s32.totalorder %s808_s20, 1 }
  0x18   : > { %p255_p2 = scmp.lt.s32.totalorder %s808_s20, 3  ;;  %s212_s14 = scalar_lea.sflag [#allocation3], %s211_s5 }
  0x19   : > { %593 = dma.hbm_to_vmem [thread:$0]  (!%p591_p0), %s226_s13, 64, %s228_s12, %s212_s14  }
  0x1a   : > { %p256_p3 = pnand %p575_p1, %p255_p2  ;;  %s246_s24 = scalar_lea.hbm %s990_s2, %s572_s7 }
  0x1b   : > { %s238_s26 = scalar_lea.vmem [#allocation5], %s571_s6  ;;  %s248_s8 = sshll.u32 %s246_s24, 4  ;;  %s249_s8 = int_to_ptr.hbm [resolvable:$true] %s248_s8 }
  0x1c   : > { %s250_s23 = sshll.u32 %s238_s26, 4  ;;  %s235_s9 = scalar_lea.sflag [#allocation6], %s211_s5  ;;  %s251_s23 = int_to_ptr.vmem [resolvable:$true] %s250_s23 }
  0x1d   : > { %596 = dma.hbm_to_vmem [thread:$0]  (!%p591_p0), %s249_s8, 64, %s251_s23, %s235_s9  }
  0x1e   : > { %259 = sbr.rel (%p256_p3) target bundleno = 299 (0x12b), region = 36  ;;  %s919_s25 = sand.u32 (!%p256_p3), 1, %s792_s16  }
  0x1f   : > { %s262_s10 = scalar_lea.sflag (!%p256_p3), [#allocation3], %s919_s25 }
  0x23   : > { %775 = dma.done.wait (%p889_p8), %s262_s10, 64  }
  0x24   : > { %777 = vsyncadd (%p889_p8), %s262_s10, 4294967232  ;;  %s577_s6 = sshll.u32 %s919_s25, 2  ;;  %s272_s7 = scalar_lea.sflag [#allocation6], %s919_s25 }
  0x25   : > { %s275_s11 = scalar_lea.vmem [#allocation5], %s577_s6 }
  0x26   : > { %779 = dma.done.wait (%p889_p8), %s272_s7, 64  }
  0x27   : > { %781 = vsyncadd (%p889_p8), %s272_s7, 4294967232  ;;  %vm341_vm0 = vcmask 1041408   ;;  %vm343_vm1 = vcmask 1043456   ;;  %v810_v0 = vmov 0.0   ;;  %p313_p4 = scmp.lt.s32.totalorder %s800_s18, 1  ;;  %vm345_vm2 = vcmask 1045504  }
  0x28   : > { %v374_v1 = vperm.slane %v810_v0, 0  ;;  %v375_v2 = vperm.slane %v810_v0, 1  ;;  %v376_v3 = vperm.slane %v810_v0, 2  ;;  %v377_v4 = vperm.slane %v810_v0, 3  ;;  %s813_s5 = smov 2   ;;  %v327_v12 = vld [vmem:[%s991_s3] sm:$0xff] }
  0x29   : > { %v811_v6 = vmov 1   ;;  %s314_s23 = scalar_select %p313_p4, %s800_s18, 1  ;;  %v812_v7 = vmov 2   ;;  %v347_v10 = vld [vmem:[%s275_s11] sm:$0xf]  ;;  %v814_v20 = vmov 0   ;;  %v329_v21 = vlaneseq }
  0x2a   : > { %v378_v5 = vsel %vm341_vm0, %v374_v1, %v375_v2  ;;  %658 = vset.pattern.permute.xlu1 %v811_v6  ;;  %659 = vset.pattern.permute.xlu2 %v812_v7  ;;  %vm389_vm4 = vcmask 15360   ;;  %s815_s24 = smov 126   ;;  %s816_s26 = smov 124   ;;  %vm410_vm5 = vcmask 1031168   ;;  %vm426_vm6 = vcmask 1014784  }
  0x2b   : > { %v379_v8 = vsel %vm343_vm1, %v378_v5, %v376_v3  ;;  %661 = vset.pattern.permute.xlu0 %v812_v7  ;;  %s579_s27 = sshll.u32 %s314_s23, 2  ;;  %415 = vperm.xlu2 %659, %v327_v12   ;;  %v330_v22 = vand.u32 127, %v329_v21  ;;  %s578_s8 = sshll.u32 %s919_s25, 3 }
  0x2c   : > { %v380_v9 = vsel %vm345_vm2, %v379_v8, %v377_v4  ;;  %s319_s14 = scalar_lea.vmem %s988_s0, %s579_s27  ;;  %355 = vrot.lane.b32.xlu0 %v347_v10, %s813_s5  ;;  %s581_s9 = sshll.u32 %s800_s18, 3 }
  0x2d   : > { %386 = vrot.lane.b32.xlu1 %v380_v9, %s813_s5  ;;  %v328_v11 = vld [vmem:[%s319_s14] sm:$0xf]  ;;  %v350_v23 = vadd.s32 4294967294, %v330_v22  ;;  %s443_s7 = scalar_lea.hbm %s992_s4, %s581_s9  ;;  %s312_s11 = scalar_lea.vmem [#allocation7], %s578_s8 }
  0x2e   : > { %v337_v13 = vperm.slane %v328_v11, 0  ;;  %v338_v14 = vperm.slane %v328_v11, 1  ;;  %v339_v15 = vperm.slane %v328_v11, 2  ;;  %v340_v16 = vperm.slane %v328_v11, 3  ;;  %s445_s23 = sshll.u32 %s312_s11, 4  ;;  %s447_s27 = sshll.u32 %s443_s7, 4  ;;  %s446_s23 = int_to_ptr.vmem [resolvable:$true] %s445_s23  ;;  %s448_s27 = int_to_ptr.hbm [resolvable:$true] %s447_s27 }
  0x2f   : > { %vm351_vm3 = vcmp.ge.s32.totalorder %v350_v23, 0  ;;  %s432_s18 = scalar_lea.sflag [#allocation4], %s919_s25  ;;  %s742_s21 = scalar_lea.hbm %s992_s4, 16 }
  0x30   : > { %v342_v17 = vsel %vm341_vm0, %v337_v13, %v338_v14 }
  0x31   : > { %v344_v18 = vsel %vm343_vm1, %v342_v17, %v339_v15 }
  0x32   : > { %v346_v19 = vsel %vm345_vm2, %v344_v18, %v340_v16 }
  0x33   : > { %660 = vset.pattern.permute.xlu2 %v814_v20 }
  0x34   : > { %382 = vrot.lane.b32.xlu0 %v346_v19, %s813_s5  ;;  %394 = vperm.xlu2 %660, %v327_v12   ;;  %s736_s5 = sshra.s32 %s448_s27, 4  ;;  %s737_s5 = int_to_ptr.hbm [resolvable:$true] %s736_s5 }
  0x35   : > { %399 = vperm.xlu1 %658, %v327_v12   ;;  %s738_s12 = scalar_lea.hbm %s737_s5, 8  ;;  %p743_p8 = scmp.lt.s32.totalorder %s737_s5, %s992_s4 }
  0x36   : > { %p739_p5 = scmp.ne.s32.totalorder %s737_s5, %s738_s12  ;;  %p744_p10 = scmp.lt.s32.totalorder %s742_s21, %s738_s12 }
  0x38   : > { %p740_p6 = pnand %p739_p5, %p893_p9  ;;  %p745_p13 = por %p744_p10, %p743_p8 }
  0x3a   : > { %p741_p7 = pneg %p740_p6 }
  0x3c   : > { %p746_p0 = pnand %p745_p13, %p741_p7 }
  0x85   : > { %v416_v38 = vpop.permute.xlu2 %415 }
  0x8e   : > { %v395_v43 = vpop.permute.xlu2 %394 }
  0x9e   : > { %v356_v25 = vpop.permute.xlu0 %355 }
  0x9f   : > { %v387_v24 = vpop.permute.xlu1 %386  ;;  %v358_v26 = vsel %vm351_vm3, %v356_v25, 0.0 }
  0xa0   : > { %v359_v27 = vperm.slane %v358_v26, 0  ;;  %v360_v28 = vperm.slane %v358_v26, 1  ;;  %v361_v29 = vperm.slane %v358_v26, 2  ;;  %v362_v32 = vperm.slane %v358_v26, 3 }
  0xa2   : > { %v363_v30 = vsel %vm341_vm0, %v359_v27, %v360_v28 }
  0xa3   : > { %v364_v31 = vsel %vm343_vm1, %v363_v30, %v361_v29 }
  0xa4   : > { %v365_v34 = vsel %vm345_vm2, %v364_v31, %v362_v32 }
  0xa6   : > { %v383_v35 = vpop.permute.xlu0 %382 }
  0xa7   : > { %v400_v33 = vpop.permute.xlu1 %399  ;;  %v390_v36 = vsel %vm389_vm4, %v365_v34, %v383_v35  ;;  %v391_v37 = vsel %vm389_vm4, %v383_v35, %v387_v24 }
  0xa8   : > { %v402_v39 = vmul.f32 %v400_v33, %v390_v36  ;;  %v403_v40 = vmul.f32 %v400_v33, %v391_v37  ;;  %v418_v41 = vmul.f32 %v416_v38, %v390_v36  ;;  %v419_v42 = vmul.f32 %v416_v38, %v391_v37 }
  0xa9   : > { %v397_v47 = vmul.f32 %v395_v43, %v390_v36 }
  0xaa   : > { %408 = vrot.lane.b32.xlu1 %v403_v40, %s815_s24  ;;  %406 = vrot.lane.b32.xlu0 %v402_v39, %s815_s24 }
  0xab   : > { %422 = vrot.lane.b32.xlu2 %v418_v41, %s816_s26 }
  0xb2   : > { %424 = vrot.lane.b32.xlu0 %v419_v42, %s816_s26 }
 0x105   : > { %v423_v48 = vpop.permute.xlu2 %422 }
 0x11c   : > { %v407_v44 = vpop.permute.xlu0 %406  ;;  %v409_v45 = vpop.permute.xlu1 %408 }
 0x11d   : > { %v411_v46 = vsel %vm410_vm5, %v407_v44, %v409_v45 }
 0x11e   : > { %v413_v49 = vadd.f32 %v411_v46, %v397_v47 }
 0x124   : > { %v425_v50 = vpop.permute.xlu0 %424 }
 0x125   : > { %v427_v51 = vsel %vm426_vm6, %v423_v48, %v425_v50 }
 0x126   : > { %v429_v52 = vadd.f32 %v427_v51, %v413_v49 }
 0x128   : > { %430 = vst [vmem:[%s312_s11] sm:$0xff] %v429_v52 }
 0x129   : > { %749 = shalt.err (!%p746_p0)
}
 0x12a   : > { %588 = dma.vmem_to_hbm [thread:$0]  (%p893_p9), %s446_s23, 128, %s448_s27, %s432_s18  }
 0x12b PF: > { %s459_s25 = sand.u32 1, %s788_s15   ;;  %p598_p1 = pnand %p570_p12, %p900_p11 }
 0x12c   : > { %s460_s26 = scalar_lea.sflag [#allocation4], %s459_s25 }
 0x12d   : > { %p599_p2 = pneg %p598_p1 }
 0x12f   : > { %783 = dma.done.wait (%p599_p2), %s460_s26, 128  }
 0x130   : > { %785 = vsyncadd (%p599_p2), %s460_s26, 4294967168  ;;  %s23_s20 = sadd.s32 1, %s808_s20   ;;  %s999_s28 = sld [smem:[#allocation11_spill]] }
 0x131   : > { %p20_p3 = scmp.ge.s32.totalorder %s23_s20, 4   ;;  %s1000_s15 = smov %s792_s16 }
 0x132   : > { %s1001_s16 = smov %s796_s17  ;;  %s1002_s17 = smov %s898_s29 }
 0x133   : > { %s1003_s18 = smov %s804_s19  ;;  %22 = sbr.rel (!%p20_p3) target bundleno = 8 (0x8), region = 97 }
 0x136   : > { %s1004_s19 = smov %s999_s28 }
 0x138   :  { %466 = vsyncpa [#allocation3], 1 }
 0x139   :  { %468 = vsyncpa [#allocation3 + $0x1], 1 }
 0x13a   :  { %469 = vsyncpa [#allocation6], 1 }
 0x13b   :  { %471 = vsyncpa [#allocation6 + $0x1], 1 }
 0x13c   :  { %472 = vsyncpa [#allocation4], 1 }
 0x13d   :  { %474 = vsyncpa [#allocation4 + $0x1], 1 }

</bundles_post_ra>
